<compile_context>
chip_gen: v7x
topology: tpu7x:2x2x1
jax: 0.10.0
libtpu: 0.0.40
codegen_flags: <defaults>
</compile_context>

<pallas_src>
import functools

import jax
import jax.numpy as jnp
from jax import lax
from jax.experimental import pallas as pl
from jax.experimental.pallas import tpu as pltpu

GAMMA = 2.0
LABEL_SMOOTHING = 0.1

_MIB = 1024 * 1024
_MAX_TILE_ROWS = 16 * 1024     # generous row cap; bytes are the real limiter
_F32_TEMPS = 6                 # ~full-width f32 temporaries live in the kernel


def _round_up(x, m):
    return ((x + m - 1) // m) * m


def _tpu_memory_profile():
    """(vmem_limit_bytes, assume_two_tensorcores) for the local TPU generation."""
    vmem_phys = None
    try:
        info = pltpu.get_tpu_info()
        for attr in ("vmem_capacity_bytes", "vmem_bytes", "vmem_size_bytes"):
            v = getattr(info, attr, None)
            if v:
                vmem_phys = int(v)
                break
    except Exception:
        vmem_phys = None
    if vmem_phys is None or vmem_phys <= 96 * _MIB:
        # v7x-class (64 MiB VMEM per TensorCore, 2 TCs) or unknown: conservative.
        return 48 * _MIB, True
    # v5e / v6e: 128 MiB VMEM, single TensorCore -> bigger tiles, higher limit.
    return 64 * _MIB, False


def _pick_tile_n(n, c, itemsize, vmem_limit, two_core):
    """Rows per grid step.

    Byte-based: double-buffered native-dtype logits tile plus ~_F32_TEMPS f32
    full-width in-kernel temporaries must fit in ~half the scoped VMEM limit.
    On two-TensorCore parts also cap so the single "parallel" grid axis has
    at least ~4 steps to shard across both cores.
    """
    sub = 8 * max(1, 4 // max(1, itemsize))          # 8 rows f32, 16 rows bf16
    per_row = 2 * c * itemsize + _F32_TEMPS * c * 4
    t = int((vmem_limit // 2) // max(1, per_row))
    t = max(sub, min(_MAX_TILE_ROWS, (t // sub) * sub))
    if two_core:
        t = min(t, max(sub, _round_up(pl.cdiv(n, 4), sub)))
    return t


def _focal_loss_kernel(logits_ref, aux_ref, out_ref, *, gamma, eps, aux_is_xtgt):
    # Cast AFTER the DMA so HBM traffic stays in the input dtype (e.g. bf16).
    x = logits_ref[...].astype(jnp.float32)                    # (rows, C)
    rows, c = x.shape

    # Stable log-softmax pieces; the full logp tile is never materialized.
    m = jnp.max(x, axis=-1, keepdims=True)                     # (rows, 1)
    z = x - m                                                  # (rows, C)
    lse = jnp.log(jnp.sum(jnp.exp(z), axis=-1, keepdims=True))
    z_sum = jnp.sum(z, axis=-1, keepdims=True)

    if aux_is_xtgt:
        # Target logit was gathered in the wrapper (v7x VALU/XLU trim).
        z_tgt = aux_ref[...].astype(jnp.float32) - m
    else:
        tgt = aux_ref[...]                                     # (rows, 1) int32
        col = lax.broadcasted_iota(jnp.int32, (rows, c), 1)
        z_tgt = jnp.sum(jnp.where(col == tgt, z, 0.0), axis=-1, keepdims=True)

    # Cross-entropy with label smoothing (PyTorch semantics):
    #   logp_tgt = z_tgt - lse ; sum_c logp = z_sum - C * lse
    ce = -((1.0 - eps) * (z_tgt - lse) + (eps / c) * (z_sum - c * lse))

    # Focal modulation; pt = exp(-ce) uses the *smoothed* CE exactly like the
    # PyTorch module.  gamma == 2 -> one VPU multiply, no pow on the EUP.
    pt = jnp.exp(-ce)
    omp = 1.0 - pt
    if gamma == 2.0:
        mod = omp * omp
    elif float(gamma).is_integer() and gamma >= 0:
        mod = jnp.ones_like(omp)
        for _ in range(int(gamma)):
            mod = mod * omp
    else:
        mod = jnp.exp(gamma * jnp.log(jnp.maximum(omp, 1e-30)))
    focal = mod * ce                                            # (rows, 1)

    # Per-tile partial sum splatted into a lane-dense (1, 8, 128) block
    # (single unmasked full-vreg store).
    out_ref[...] = jnp.broadcast_to(jnp.sum(focal), out_ref.shape)


def _partial_sum(kernel, logits, aux, *, block_rows, num_tiles, vmem_limit,
                 buffer_depth=None):
    c = logits.shape[-1]
    logits_spec_kwargs = {}
    if buffer_depth is not None and buffer_depth != 2:
        # Deeper prefetch for the logits stream (use only on v5e/v6e if the
        # trace still shows exposed DMA; keep default depth 2 on v7x).
        logits_spec_kwargs["pipeline_mode"] = pl.Buffered(buffer_depth)
    partials = pl.pallas_call(
        kernel,
        out_shape=jax.ShapeDtypeStruct((num_tiles, 8, 128), jnp.float32),
        grid=(num_tiles,),
        in_specs=[
            pl.BlockSpec((block_rows, c), lambda i: (i, 0), **logits_spec_kwargs),
            pl.BlockSpec((block_rows, 1), lambda i: (i, 0)),
        ],
        out_specs=pl.BlockSpec((1, 8, 128), lambda i: (i, 0, 0)),
        compiler_params=pltpu.CompilerParams(
            dimension_semantics=("parallel",),
            vmem_limit_bytes=vmem_limit,
        ),
    )(logits, aux)
    # Dense reduce: every lane of each (8,128) block holds the same tile sum,
    # so sum-everything / 1024 (exact power-of-two rescale) avoids the strided
    # partials[:, 0, 0] gather.
    return jnp.sum(partials) * (1.0 / (8 * 128))


def focal_loss(logits, targets, *, gamma=GAMMA, label_smoothing=LABEL_SMOOTHING,
               tile_n=None, precompute_target_logit=False, buffer_depth=None):
    """logits: [N, C] float (any dtype); targets: [N] int. Returns f32 scalar."""
    n, c = logits.shape
    itemsize = jnp.dtype(logits.dtype).itemsize
    vmem_limit, two_core = _tpu_memory_profile()
    sub = 8 * max(1, 4 // max(1, itemsize))
    if tile_n is None:
        tile_n = _pick_tile_n(n, c, itemsize, vmem_limit, two_core)
    else:
        tile_n = max(sub, _round_up(int(tile_n), sub))

    targets = targets.astype(jnp.int32)
    if precompute_target_logit:
        # Compute-bound option (v7x / bf16-on-v6e): gather x[target] once in
        # the wrapper so the kernel drops the full-tile one-hot
        # iota/compare/select and one lane reduction.  Costs one extra HBM
        # pass over logits, so keep it off on HBM-bound chips.
        aux = jnp.take_along_axis(logits, targets[:, None], axis=-1)   # (N, 1)
    else:
        aux = targets.reshape(n, 1)                                     # (N, 1)

    kernel = functools.partial(_focal_loss_kernel, gamma=gamma,
                               eps=label_smoothing,
                               aux_is_xtgt=precompute_target_logit)

    if tile_n >= n:
        # One block covering every row (block dims == full array dims, so no
        # (8,128) divisibility constraint and no edge padding to reason about).
        total = _partial_sum(kernel, logits, aux, block_rows=n, num_tiles=1,
                             vmem_limit=vmem_limit, buffer_depth=buffer_depth)
    else:
        # Main pass: exactly-divisible prefix streamed from the *unpadded*
        # arrays (the grid simply never indexes past n_main rows).
        n_main = (n // tile_n) * tile_n
        total = _partial_sum(kernel, logits, aux, block_rows=tile_n,
                             num_tiles=n_main // tile_n,
                             vmem_limit=vmem_limit, buffer_depth=buffer_depth)
        rem = n - n_main
        if rem:
            # Ragged tail (< one tile): tiny single-block call on a row slice;
            # only `rem` rows are re-materialized, never the whole logits
            # array (the old jnp.pad re-copied all N x C elements).
            total = total + _partial_sum(kernel, logits[n_main:], aux[n_main:],
                                         block_rows=rem, num_tiles=1,
                                         vmem_limit=vmem_limit)
    # TODO(synk): the final mean over per-tile partial sums stays an XLA reduce
    # in the wrapper so the kernel's single grid axis remains fully "parallel"
    # (megacore-shardable) instead of serializing on an in-kernel accumulator.
    return total / jnp.float32(n)


def _focal_loss_ref(logits, targets, gamma=GAMMA, eps=LABEL_SMOOTHING):
    # Pure-JAX reference matching F.cross_entropy(label_smoothing=0.1) + focal.
    n, c = logits.shape
    logp = jax.nn.log_softmax(logits.astype(jnp.float32), axis=-1)
    logp_tgt = jnp.take_along_axis(logp, targets[:, None].astype(jnp.int32), axis=-1)[:, 0]
    ce = -((1.0 - eps) * logp_tgt + (eps / c) * jnp.sum(logp, axis=-1))
    pt = jnp.exp(-ce)
    return jnp.mean(((1.0 - pt) ** gamma) * ce)


if __name__ == "__main__":
    key = jax.random.PRNGKey(0)

    # 1) Small shape consistent with the module (single block, no tail).
    k1, k2 = jax.random.split(key)
    N, C = 8, 16
    logits = jax.random.normal(k1, (N, C), dtype=jnp.float32)
    targets = jax.random.randint(k2, (N,), 0, C, dtype=jnp.int32)
    out = focal_loss(logits, targets)
    jax.block_until_ready(out)
    ref = _focal_loss_ref(logits, targets)
    assert jnp.allclose(out, ref, rtol=1e-5, atol=1e-5), (out, ref)

    # 2) Multi-tile main grid plus a ragged tail block (no logits padding).
    k3, k4 = jax.random.split(k1)
    N2, C2 = 20, 16
    logits2 = jax.random.normal(k3, (N2, C2), dtype=jnp.float32)
    targets2 = jax.random.randint(k4, (N2,), 0, C2, dtype=jnp.int32)
    out2 = focal_loss(logits2, targets2, tile_n=8)   # main: 2 tiles, tail: 4 rows
    jax.block_until_ready(out2)
    ref2 = _focal_loss_ref(logits2, targets2)
    assert jnp.allclose(out2, ref2, rtol=1e-5, atol=1e-5), (out2, ref2)

    # 3) bf16 logits: DMA'd as bf16, cast to f32 only inside the kernel.
    k5, k6 = jax.random.split(k2)
    logits3 = jax.random.normal(k5, (16, 16), dtype=jnp.float32).astype(jnp.bfloat16)
    targets3 = jax.random.randint(k6, (16,), 0, 16, dtype=jnp.int32)
    out3 = focal_loss(logits3, targets3)
    jax.block_until_ready(out3)
    ref3 = _focal_loss_ref(logits3.astype(jnp.float32), targets3)
    assert jnp.allclose(out3, ref3, rtol=1e-4, atol=1e-4), (out3, ref3)

    # 4) Hoisted target-logit gather (compute-bound / v7x path), ragged grid.
    out4 = focal_loss(logits2, targets2, tile_n=8, precompute_target_logit=True)
    jax.block_until_ready(out4)
    assert jnp.allclose(out4, ref2, rtol=1e-5, atol=1e-5), (out4, ref2)

    print("KERNEL_OK")
</pallas_src>

<mosaic_0001>
module attributes {stable_mosaic.version = 11 : i64} {
  func.func @_focal_loss_kernel(%arg0: i32, %arg1: memref<8x16xf32, #tpu.memory_space<vmem>>, %arg2: memref<8x1xi32, #tpu.memory_space<vmem>>, %arg3: memref<1x8x128xf32, #tpu.memory_space<vmem>>) attributes {dimension_semantics = [#tpu.dimension_semantics<parallel>], iteration_bounds = array<i64: 1>, scalar_prefetch = 0 : i64, scratch_operands = 0 : i64, tpu.core_type = #tpu.core_type<tc>, window_params = [{transform_indices = @transform_0, window_bounds = array<i64: 8, 16>}, {transform_indices = @transform_1, window_bounds = array<i64: 8, 1>}, {transform_indices = @transform_2, window_bounds = array<i64: 1, 8, 128>}]} {
    %c0 = arith.constant 0 : index
    %c0_0 = arith.constant 0 : index
    %0 = vector.load %arg1[%c0, %c0_0] : memref<8x16xf32, #tpu.memory_space<vmem>>, vector<8x16xf32>
    %cst = arith.constant dense<0xFF800000> : vector<8xf32>
    %1 = vector.multi_reduction <maximumf>, %0, %cst [1] : vector<8x16xf32> to vector<8xf32>
    %2 = vector.shape_cast %1 : vector<8xf32> to vector<8x1xf32>
    %3 = vector.broadcast %2 : vector<8x1xf32> to vector<8x16xf32>
    %4 = arith.subf %0, %3 : vector<8x16xf32>
    %5 = math.exp %4 : vector<8x16xf32>
    %cst_1 = arith.constant dense<0.000000e+00> : vector<8xf32>
    %6 = vector.multi_reduction <add>, %5, %cst_1 [1] : vector<8x16xf32> to vector<8xf32>
    %7 = vector.shape_cast %6 : vector<8xf32> to vector<8x1xf32>
    %8 = math.log %7 : vector<8x1xf32>
    %cst_2 = arith.constant dense<0.000000e+00> : vector<8xf32>
    %9 = vector.multi_reduction <add>, %4, %cst_2 [1] : vector<8x16xf32> to vector<8xf32>
    %10 = vector.shape_cast %9 : vector<8xf32> to vector<8x1xf32>
    %c0_3 = arith.constant 0 : index
    %c0_4 = arith.constant 0 : index
    %11 = vector.load %arg2[%c0_3, %c0_4] : memref<8x1xi32, #tpu.memory_space<vmem>>, vector<8x1xi32>
    %12 = tpu.iota {dimensions = array<i32: 1>} : vector<8x16xi32>
    %13 = vector.broadcast %11 : vector<8x1xi32> to vector<8x16xi32>
    %14 = arith.cmpi eq, %12, %13 : vector<8x16xi32>
    %cst_5 = arith.constant 0.000000e+00 : f32
    %15 = vector.broadcast %cst_5 : f32 to vector<8x16xf32>
    %16 = arith.select %14, %4, %15 : vector<8x16xi1>, vector<8x16xf32>
    %cst_6 = arith.constant dense<0.000000e+00> : vector<8xf32>
    %17 = vector.multi_reduction <add>, %16, %cst_6 [1] : vector<8x16xf32> to vector<8xf32>
    %18 = vector.shape_cast %17 : vector<8xf32> to vector<8x1xf32>
    %19 = arith.subf %18, %8 : vector<8x1xf32>
    %cst_7 = arith.constant 0.899999976 : f32
    %20 = vector.broadcast %cst_7 : f32 to vector<8x1xf32>
    %21 = arith.mulf %20, %19 : vector<8x1xf32>
    %cst_8 = arith.constant 1.600000e+01 : f32
    %22 = vector.broadcast %cst_8 : f32 to vector<8x1xf32>
    %23 = arith.mulf %22, %8 : vector<8x1xf32>
    %24 = arith.subf %10, %23 : vector<8x1xf32>
    %cst_9 = arith.constant 6.250000e-03 : f32
    %25 = vector.broadcast %cst_9 : f32 to vector<8x1xf32>
    %26 = arith.mulf %25, %24 : vector<8x1xf32>
    %27 = arith.addf %21, %26 : vector<8x1xf32>
    %cst_10 = arith.constant 0.000000e+00 : f32
    %28 = vector.broadcast %cst_10 : f32 to vector<8x1xf32>
    %29 = arith.subf %28, %27 : vector<8x1xf32>
    %cst_11 = arith.constant 0.000000e+00 : f32
    %30 = vector.broadcast %cst_11 : f32 to vector<8x1xf32>
    %31 = arith.subf %30, %29 : vector<8x1xf32>
    %32 = math.exp %31 : vector<8x1xf32>
    %cst_12 = arith.constant 1.000000e+00 : f32
    %33 = vector.broadcast %cst_12 : f32 to vector<8x1xf32>
    %34 = arith.subf %33, %32 : vector<8x1xf32>
    %35 = arith.mulf %34, %34 : vector<8x1xf32>
    %36 = arith.mulf %35, %29 : vector<8x1xf32>
    %37 = vector.shape_cast %36 : vector<8x1xf32> to vector<1x8x1xf32>
    %cst_13 = arith.constant dense<0.000000e+00> : vector<1xf32>
    %38 = vector.multi_reduction <add>, %37, %cst_13 [1, 2] : vector<1x8x1xf32> to vector<1xf32>
    %39 = vector.shape_cast %38 : vector<1xf32> to vector<1x1x1xf32>
    %40 = vector.extract %39[0, 0, 0] : f32 from vector<1x1x1xf32>
    %41 = vector.broadcast %40 : f32 to vector<1x8x128xf32>
    %c0_14 = arith.constant 0 : index
    %c0_15 = arith.constant 0 : index
    %c0_16 = arith.constant 0 : index
    %42 = vector.load %arg3[%c0_14, %c0_15, %c0_16] : memref<1x8x128xf32, #tpu.memory_space<vmem>>, vector<1x8x128xf32>
    tpu.vector_store %arg3[%c0_14, %c0_15, %c0_16], %41 {strides = array<i32>} : memref<1x8x128xf32, #tpu.memory_space<vmem>>, vector<1x8x128xf32>,
    return
  }
  func.func @transform_0(%arg0: i32) -> (i32, i32) {
    %c0_i32 = arith.constant 0 : i32
    %c0_i32_0 = arith.constant 0 : i32
    return %arg0, %c0_i32 : i32, i32
  }
  func.func @transform_1(%arg0: i32) -> (i32, i32) {
    %c0_i32 = arith.constant 0 : i32
    %c0_i32_0 = arith.constant 0 : i32
    return %arg0, %c0_i32 : i32, i32
  }
  func.func @transform_2(%arg0: i32) -> (i32, i32, i32) {
    %c0_i32 = arith.constant 0 : i32
    %c0_i32_0 = arith.constant 0 : i32
    %c0_i32_1 = arith.constant 0 : i32
    return %arg0, %c0_i32, %c0_i32_0 : i32, i32, i32
  }
}

</mosaic_0001>

<bundles_post_ra>
// kernel: tpu_custom_call.1
= control target key start
LH: loop header
LB: loop body
LE: loop exit
PB: predicated region body
PF: predicated region fallthrough
CT: control target
= control target key end

     0   :  { %vm13_vm0 = vcmask 130048   ;;  %s153_s0 = inlined_call_operand.vmem [shape: f32[8,16], index: 0, kind: input, shape index: {}]   ;;  %s154_s1 = inlined_call_operand.vmem [shape: s32[8,1], index: 1, kind: input, shape index: {}]   ;;  %s155_s2 = inlined_call_operand.hbm [shape: f32[1,8,128], index: 2, kind: output, shape index: {}]  }
   0x1   :  { %v12_v0 = vld [vmem:[%s153_s0] sm:$0xff] }
   0x2   :  { %7 = vsyncpa [#allocation3], 0  ;;  %v14_v1 = vsel %vm13_vm0, %v12_v0, -inf  ;;  %v114_v2 = vmov 0   ;;  %v28_v3 = vld [vmem:[%s154_s1] sm:$0xff]  ;;  %v29_v7 = vlaneseq  ;;  %vm52_vm2 = vcmask 7168  }
   0x3   :  { %83 = vset.pattern.permute.xlu0 %v114_v2  ;;  %s115_s0 = smov [#allocation2]  }
   0x4   :  { %15 = vmax.xlane.f32.xlu0 %v14_v1  ;;  %v30_v8 = vand.u32 127, %v29_v7  ;;  %s71_s1 = sshll.u32 %s115_s0, 4  ;;  %s72_s1 = int_to_ptr.vmem [resolvable:$true] %s71_s1 }
   0x5   :  { %s90_s14 = scalar_lea.vmem %s72_s1, 128  ;;  %p95_p1 = scmp.lt.s32.totalorder %s72_s1, %s72_s1 }
   0x6   :  { %p91_p0 = scmp.ne.s32.totalorder %s72_s1, %s90_s14  ;;  %p96_p2 = scmp.lt.s32.totalorder %s90_s14, %s90_s14 }
   0x8   :  { %p97_p3 = por %p96_p2, %p95_p1 }
   0xa   :  { %p98_p4 = pnand %p97_p3, %p91_p0 }
  0x1a   :  { %32 = vperm.xlu0 %83, %v28_v3  }
  0x91   :  { %v16_v4 = vpop.xlane.xlu0 %15 }
  0x92   :  { %v17_v5 = vsub.f32 %v12_v0, %v16_v4 }
  0x94   :  { %v18_v6 = vmul.f32 1.442695, %v17_v5  ;;  %v25_v12 = vsel %vm13_vm0, %v17_v5, 0.0 }
  0x96   :  { %84 = vpow2.f32 %v18_v6 }
  0x99   :  { %v33_v10 = vpop.permute.xlu0 %32 }
  0x9a   :  { %vm34_vm1 = vcmp.eq.s32.totalorder %v30_v8, %v33_v10 }
  0x9b   :  { %v35_v13 = vsel %vm34_vm1, %v17_v5, 0.0 }
  0x9c   :  { %v36_v14 = vsel %vm13_vm0, %v35_v13, 0.0 }
  0xa0   :  { %v85_v9 = vpop.eup %84 }
  0xa1   :  { %v20_v11 = vsel %vm13_vm0, %v85_v9, 0.0 }
  0xa2   :  { %21 = vadd.xlane.f32.xlu1 %v20_v11 }
  0xa6   :  { %26 = vadd.xlane.f32.xlu1 %v25_v12 }
  0xaa   :  { %37 = vadd.xlane.f32.xlu1 %v36_v14 }
 0x12f   :  { %v22_v15 = vpop.xlane.xlu1 %21 }
 0x130   :  { %86 = vlog2.f32 %v22_v15 }
 0x133   :  { %v27_v16 = vpop.xlane.xlu1 %26 }
 0x137   :  { %v38_v19 = vpop.xlane.xlu1 %37 }
 0x13a   :  { %v87_v17 = vpop.eup %86 }
 0x13b   :  { %v24_v18 = vmul.f32 0.6931472, %v87_v17 }
 0x13d   :  { %v41_v20 = vmul.f32 16.0, %v24_v18  ;;  %v39_v21 = vsub.f32 %v38_v19, %v24_v18 }
 0x13f   :  { %v42_v22 = vsub.f32 %v27_v16, %v41_v20  ;;  %v40_v24 = vmul.f32 0.9, %v39_v21 }
 0x141   :  { %v43_v23 = vmul.f32 0.00625, %v42_v22 }
 0x143   :  { %v44_v25 = vadd.f32 %v43_v23, %v40_v24 }
 0x145   :  { %v45_v26 = vsub.f32 0.0, %v44_v25 }
 0x147   :  { %v46_v27 = vsub.f32 0.0, %v45_v26 }
 0x149   :  { %v47_v28 = vmul.f32 1.442695, %v46_v27 }
 0x14b   :  { %88 = vpow2.f32 %v47_v28 }
 0x155   :  { %v89_v29 = vpop.eup %88 }
 0x156   :  { %v49_v30 = vsub.f32 1.0, %v89_v29 }
 0x158   :  { %v50_v31 = vmul.f32 %v49_v30, %v49_v30 }
 0x15a   :  { %v51_v32 = vmul.f32 %v50_v31, %v45_v26 }
 0x15c   :  { %v53_v33 = vsel %vm52_vm2, %v51_v32, 0.0 }
 0x15d   :  { %54 = vadd.xlane.f32.xlu1 %v53_v33 }
 0x1ea   :  { %v55_v34 = vpop.xlane.xlu1 %54 }
 0x1eb   :  { %v56_v35 = vrot.slane %v55_v34, 4 }
 0x1ed   :  { %v57_v36 = vadd.f32 %v56_v35, %v55_v34 }
 0x1ef   :  { %v58_v37 = vrot.slane %v57_v36, 2 }
 0x1f1   :  { %v59_v38 = vadd.f32 %v58_v37, %v57_v36 }
 0x1f3   :  { %v60_v39 = vrot.slane %v59_v38, 1 }
 0x1f5   :  { %v61_v40 = vadd.f32 %v60_v39, %v59_v38 }
 0x1f7   :  { %79 = vpush %v61_v40 }
 0x228   :  { %s80_s13 = spop %79 }
 0x229   :  { %v63_v41 = vstv %s80_s13 }
 0x22a   :  { %64 = vst [vmem:[#allocation2] sm:$0xff] %v63_v41 }
 0x22b   :  { %101 = shalt.err (!%p98_p4)
}
 0x22c   :  { %s102_s17 = scalar_lea.hbm %s155_s2, 128 }
 0x22d   :  { %p103_p5 = scmp.ne.s32.totalorder %s155_s2, %s102_s17  ;;  %p106_p6 = scmp.lt.u32.totalorder %s102_s17, %s155_s2 }
 0x22f   :  { %p108_p7 = pnand %p106_p6, %p103_p5 }
 0x231   :  { %111 = shalt.err (!%p108_p7)
}
 0x232   :  { %74 = dma.vmem_to_hbm [thread:$0]  %s72_s1, 128, %s155_s2, [#allocation3]  }
 0x233   :  { %112 = dma.done.wait [#allocation3], 128  }
 0x234   :  { %113 = vsyncadd [#allocation3], 4294967168 }
 0x235   :  { %78 = vsyncpa [#allocation3], 1 }

</bundles_post_ra>
